<compile_context>
chip_gen: v5e
topology: v5e:2x2
jax: 0.10.0
libtpu: 0.0.40
codegen_flags: <defaults>
</compile_context>

<pallas_src>
import functools

import jax
import jax.numpy as jnp
from jax import lax
from jax.experimental import pallas as pl
from jax.experimental.pallas import tpu as pltpu

LN_EPS = 1e-5                      # PyTorch nn.LayerNorm default
MATMUL_DTYPE = jnp.float32         # flip to jnp.bfloat16 for ~2x MXU throughput
                                   # on v5e/v6e/v7x (keep f32 to match the serial
                                   # reference to <1e-3; on v5e keep elementwise
                                   # math f32 either way).
MAX_ROW_TILE = 256                 # row tile for the dense kernels
MAX_COL_TILE = 512                 # output-column tile for the dense kernels
MAX_FF_TILE = 512                  # dim_ff tile for the FFN kernel
MAX_CHUNK = 64                     # sequence chunk for the delta-rule kernel
VMEM_LIMIT = 48 * 1024 * 1024      # explicit scoped-VMEM budget (<= v7x 64 MiB)


# ----------------------------------------------------------------------------
# small helpers (usable both in-kernel and host-side for the reference)
# ----------------------------------------------------------------------------
def _round_up(n, m):
    return -(-n // m) * m


def _pad_dim(a, axis, size):
    if a.shape[axis] == size:
        return a
    pads = [(0, 0)] * a.ndim
    pads[axis] = (0, size - a.shape[axis])
    return jnp.pad(a, pads)


def _dense_params(sem):
    return pltpu.CompilerParams(dimension_semantics=sem,
                                vmem_limit_bytes=VMEM_LIMIT)


def _layernorm(x, g, b):
    mu = jnp.mean(x, axis=-1, keepdims=True)
    var = jnp.mean(jnp.square(x - mu), axis=-1, keepdims=True)
    return (x - mu) * lax.rsqrt(var + LN_EPS) * g + b


def _softmax_last(x):
    m = jnp.max(x, axis=-1, keepdims=True)
    e = jnp.exp(x - m)
    return e / jnp.sum(e, axis=-1, keepdims=True)


def _sigmoid(x):
    return 1.0 / (1.0 + jnp.exp(-x))


def _cast(x):
    return x.astype(MATMUL_DTYPE)


def _mm(a, b):
    return jnp.dot(_cast(a), _cast(b), preferred_element_type=jnp.float32)


# ----------------------------------------------------------------------------
# dense (row x column tiled) Pallas kernels
# ----------------------------------------------------------------------------
def _linear_bias_kernel(x_ref, w_ref, b_ref, o_ref):
    o_ref[...] = (_mm(x_ref[...], w_ref[...])
                  + b_ref[...].astype(jnp.float32)).astype(o_ref.dtype)


def _ln_linear_kernel(x_ref, g_ref, bt_ref, w_ref, o_ref):
    # LayerNorm(x) @ W   (no bias) -- FastFFlayer.slow_net path.
    # LayerNorm is recomputed per column tile: VPU work, negligible vs the matmul.
    x = x_ref[...].astype(jnp.float32)
    xn = _layernorm(x, g_ref[...].astype(jnp.float32),
                    bt_ref[...].astype(jnp.float32))
    o_ref[...] = _mm(xn, w_ref[...]).astype(o_ref.dtype)


def _out_res_kernel(x_ref, y_ref, w_ref, o_ref):
    # residual + out_linear (no bias):  x + (y @ W)
    o_ref[...] = (x_ref[...].astype(jnp.float32)
                  + _mm(y_ref[...], w_ref[...])).astype(o_ref.dtype)


def _ffn_kernel(x_ref, g_ref, bt_ref, w1_ref, b1_ref, w2_ref, b2_ref, o_ref,
                xn_ref, acc_ref):
    # TransformerFFlayers: x + Linear(ReLU(Linear(LayerNorm(x)))),
    # tiled over dim_ff (grid axis 1, "arbitrary") with a VMEM accumulator so
    # only an (H, TF)/(TF, H) weight slab is VMEM-resident per step.
    f = pl.program_id(1)

    @pl.when(f == 0)
    def _():
        x = x_ref[...].astype(jnp.float32)
        xn_ref[...] = _layernorm(x, g_ref[...].astype(jnp.float32),
                                 bt_ref[...].astype(jnp.float32))
        acc_ref[...] = jnp.zeros_like(acc_ref)

    h = jnp.maximum(_mm(xn_ref[...], w1_ref[...])
                    + b1_ref[...].astype(jnp.float32), 0.0)
    acc_ref[...] += _mm(h, w2_ref[...])

    @pl.when(f == pl.num_programs(1) - 1)
    def _():
        o_ref[...] = (x_ref[...].astype(jnp.float32) + acc_ref[...]
                      + b2_ref[...].astype(jnp.float32)).astype(o_ref.dtype)


def _row_col_tiles(n, d):
    tm = min(MAX_ROW_TILE, _round_up(n, 8))
    n_p = _round_up(n, tm)
    if d <= MAX_COL_TILE:
        tn, d_p = d, d
    else:
        tn = MAX_COL_TILE
        d_p = _round_up(d, tn)
    return tm, n_p, tn, d_p


def linear_bias(x, w, b):
    n, K = x.shape
    d = w.shape[1]
    tm, n_p, tn, d_p = _row_col_tiles(n, d)
    out = pl.pallas_call(
        _linear_bias_kernel,
        out_shape=jax.ShapeDtypeStruct((n_p, d_p), jnp.float32),
        grid=(n_p // tm, d_p // tn),
        in_specs=[pl.BlockSpec((tm, K), lambda i, j: (i, 0)),
                  pl.BlockSpec((K, tn), lambda i, j: (0, j)),
                  pl.BlockSpec((1, tn), lambda i, j: (0, j))],
        out_specs=pl.BlockSpec((tm, tn), lambda i, j: (i, j)),
        compiler_params=_dense_params(("parallel", "parallel")),
    )(_pad_dim(x, 0, n_p), _pad_dim(w, 1, d_p), _pad_dim(b, 1, d_p))
    return out[:n, :d] if (n_p, d_p) != (n, d) else out


def ln_linear(x, g, bt, w):
    n, K = x.shape
    d = w.shape[1]
    tm, n_p, tn, d_p = _row_col_tiles(n, d)
    out = pl.pallas_call(
        _ln_linear_kernel,
        out_shape=jax.ShapeDtypeStruct((n_p, d_p), jnp.float32),
        grid=(n_p // tm, d_p // tn),
        in_specs=[pl.BlockSpec((tm, K), lambda i, j: (i, 0)),
                  pl.BlockSpec((1, K), lambda i, j: (0, 0)),
                  pl.BlockSpec((1, K), lambda i, j: (0, 0)),
                  pl.BlockSpec((K, tn), lambda i, j: (0, j))],
        out_specs=pl.BlockSpec((tm, tn), lambda i, j: (i, j)),
        compiler_params=_dense_params(("parallel", "parallel")),
    )(_pad_dim(x, 0, n_p), g, bt, _pad_dim(w, 1, d_p))
    return out[:n, :d] if (n_p, d_p) != (n, d) else out


def out_linear_residual(x, y, w):
    n, K = y.shape
    d = w.shape[1]                       # == x.shape[1]
    tm, n_p, tn, d_p = _row_col_tiles(n, d)
    xp = _pad_dim(_pad_dim(x, 0, n_p), 1, d_p)
    out = pl.pallas_call(
        _out_res_kernel,
        out_shape=jax.ShapeDtypeStruct((n_p, d_p), jnp.float32),
        grid=(n_p // tm, d_p // tn),
        in_specs=[pl.BlockSpec((tm, tn), lambda i, j: (i, j)),
                  pl.BlockSpec((tm, K), lambda i, j: (i, 0)),
                  pl.BlockSpec((K, tn), lambda i, j: (0, j))],
        out_specs=pl.BlockSpec((tm, tn), lambda i, j: (i, j)),
        compiler_params=_dense_params(("parallel", "parallel")),
    )(xp, _pad_dim(y, 0, n_p), _pad_dim(w, 1, d_p))
    return out[:n, :d] if (n_p, d_p) != (n, d) else out


def ffn_block(x, g, bt, w1, b1, w2, b2):
    n, H = x.shape
    F = w1.shape[1]
    tm = min(MAX_ROW_TILE, _round_up(n, 8))
    n_p = _round_up(n, tm)
    if F <= MAX_FF_TILE:
        tf, f_p = F, F
    else:
        tf = MAX_FF_TILE
        f_p = _round_up(F, tf)
    out = pl.pallas_call(
        _ffn_kernel,
        out_shape=jax.ShapeDtypeStruct((n_p, H), jnp.float32),
        grid=(n_p // tm, f_p // tf),
        in_specs=[pl.BlockSpec((tm, H), lambda i, f: (i, 0)),
                  pl.BlockSpec((1, H), lambda i, f: (0, 0)),
                  pl.BlockSpec((1, H), lambda i, f: (0, 0)),
                  pl.BlockSpec((H, tf), lambda i, f: (0, f)),
                  pl.BlockSpec((1, tf), lambda i, f: (0, f)),
                  pl.BlockSpec((tf, H), lambda i, f: (f, 0)),
                  pl.BlockSpec((1, H), lambda i, f: (0, 0))],
        out_specs=pl.BlockSpec((tm, H), lambda i, f: (i, 0)),
        scratch_shapes=[pltpu.VMEM((tm, H), jnp.float32),
                        pltpu.VMEM((tm, H), jnp.float32)],
        compiler_params=_dense_params(("parallel", "arbitrary")),
    )(_pad_dim(x, 0, n_p), g, bt,
      _pad_dim(w1, 1, f_p), _pad_dim(b1, 1, f_p), _pad_dim(w2, 0, f_p), b2)
    return out[:n] if n_p != n else out


# ----------------------------------------------------------------------------
# delta-rule fast-weight kernel (chunkwise WY form, chunks on the grid)
# ----------------------------------------------------------------------------
def _delta_kernel(qkvb_ref, o_ref, w_ref, *, num_head, dim_head):
    # qkvb_ref: (C, 3H + nh)  lane-dense slab [Q_all | K_all | V_all | beta_all]
    # o_ref   : (C, H)        lane-dense output slab
    # w_ref   : (nh, dh, dh)  VMEM scratch -- fast-weight state [key_in, value_out],
    #                          carried across the chunk grid axis.
    nh, dh = num_head, dim_head
    H = nh * dh
    C = qkvb_ref.shape[0]

    @pl.when(pl.program_id(1) == 0)
    def _():
        w_ref[...] = jnp.zeros_like(w_ref)

    blk = qkvb_ref[...].astype(jnp.float32)                   # (C, 3H + nh)
    q = blk[:, 0 * H:1 * H].reshape(C, nh, dh)
    k = blk[:, 1 * H:2 * H].reshape(C, nh, dh)
    v = blk[:, 2 * H:3 * H].reshape(C, nh, dh)
    beta = blk[:, 3 * H:3 * H + nh]                           # (C, nh)

    # head-major tiles for the per-head (batched) MXU matmuls
    qh = _softmax_last(jnp.transpose(q, (1, 0, 2)))           # (nh, C, dh)
    kh = _softmax_last(jnp.transpose(k, (1, 0, 2)))           # (nh, C, dh)
    vh = jnp.transpose(v, (1, 0, 2))                          # (nh, C, dh)
    bh = _sigmoid(jnp.transpose(beta, (1, 0)))[:, :, None]    # (nh, C, 1)

    # chunk-local causal masks / identity
    row = lax.broadcasted_iota(jnp.int32, (1, C, C), 1)
    col = lax.broadcasted_iota(jnp.int32, (1, C, C), 2)
    strict = (col < row).astype(jnp.float32)                  # s <  t
    incl = (col <= row).astype(jnp.float32)                   # s <= t
    eye = (col == row).astype(jnp.float32)

    W0 = w_ref[...]                                           # (nh, dh, dh)

    # Delta rule (row-vector convention):
    #   u_t = beta_t (v_t - k_t W_{t-1});  W_t = W_{t-1} + k_t^T u_t
    # => (I + diag(beta) * strict_lower(K K^T)) U = beta * (V - K W0)
    kw = jnp.einsum('hcd,hde->hce', _cast(kh), _cast(W0),
                    preferred_element_type=jnp.float32)
    rhs = bh * (vh - kw)
    A = jnp.einsum('hcd,hed->hce', _cast(kh), _cast(kh),
                   preferred_element_type=jnp.float32)
    P = bh * (A * strict)                                     # strictly lower -> nilpotent

    # exact inverse via Neumann product: (I+P)^-1 = prod_j (I + (-P)^(2^j)),
    # kept in f32 so the chained C x C products do not lose accuracy.
    Minv = eye - P
    m = (C - 1).bit_length()
    if m > 1:
        Ppow = jnp.einsum('hij,hjk->hik', P, P, preferred_element_type=jnp.float32)
        for i in range(1, m):
            Minv = jnp.einsum('hij,hjk->hik', Minv, eye + Ppow,
                              preferred_element_type=jnp.float32)
            if i < m - 1:
                Ppow = jnp.einsum('hij,hjk->hik', Ppow, Ppow,
                                  preferred_element_type=jnp.float32)
    U = jnp.einsum('hcr,hrd->hcd', Minv, rhs, preferred_element_type=jnp.float32)

    # out_t = q_t W_t = q_t W0 + sum_{s<=t} (q_t . k_s) u_s
    QK = jnp.einsum('hcd,hed->hce', _cast(qh), _cast(kh),
                    preferred_element_type=jnp.float32) * incl
    out_h = (jnp.einsum('hcd,hde->hce', _cast(qh), _cast(W0),
                        preferred_element_type=jnp.float32)
             + jnp.einsum('hcs,hsd->hcd', _cast(QK), _cast(U),
                          preferred_element_type=jnp.float32))

    # carry the fast-weight state to the next chunk:  W += K^T U
    w_ref[...] = W0 + jnp.einsum('hcd,hce->hde', _cast(kh), _cast(U),
                                 preferred_element_type=jnp.float32)

    # lane-dense store: (nh, C, dh) -> (C, nh*dh)
    o_ref[...] = jnp.transpose(out_h, (1, 0, 2)).reshape(C, H).astype(o_ref.dtype)


def delta_attention(qkvb, num_head, dim_head):
    """qkvb: (B, S, 3H + nh) grouped [Q | K | V | beta]  ->  (B, S, H)."""
    B, S, cin = qkvb.shape
    H = num_head * dim_head
    C = min(MAX_CHUNK, _round_up(S, 8))
    Sp = _round_up(S, C)
    if Sp != S:
        # causal recurrence: trailing zero-padding never affects the first S rows
        qkvb = _pad_dim(qkvb, 1, Sp)
    kern = functools.partial(_delta_kernel, num_head=num_head, dim_head=dim_head)
    # TODO(synk): for v7x with tiny batch (B=1), add a head-group grid axis
    # (grid=(B, nh_groups, n_chunks)) so both TensorCores stay busy.
    out = pl.pallas_call(
        kern,
        out_shape=jax.ShapeDtypeStruct((B, Sp, H), jnp.float32),
        grid=(B, Sp // C),
        in_specs=[pl.BlockSpec((None, C, cin), lambda b, c: (b, c, 0))],
        out_specs=pl.BlockSpec((None, C, H), lambda b, c: (b, c, 0)),
        scratch_shapes=[pltpu.VMEM((num_head, dim_head, dim_head), jnp.float32)],
        compiler_params=pltpu.CompilerParams(
            dimension_semantics=("parallel", "arbitrary"),
            vmem_limit_bytes=VMEM_LIMIT),
    )(qkvb)
    return out[:, :S] if Sp != S else out


# ----------------------------------------------------------------------------
# model glue (parameter init + forward)
# ----------------------------------------------------------------------------
def _uniform(key, shape, fan_in):
    bound = 1.0 / float(fan_in) ** 0.5
    return jax.random.uniform(key, shape, jnp.float32, -bound, bound)


def init_params(key, input_dim, hidden, num_layers, num_head, dim_head, dim_ff):
    keys = iter(jax.random.split(key, 64))
    H = num_head * dim_head
    params = {
        "in_w": _uniform(next(keys), (input_dim, hidden), input_dim),
        "in_b": _uniform(next(keys), (1, hidden), input_dim),
        "layers": [],
    }
    # slow_net columns are stored GROUPED: [Q(all heads)|K(all heads)|V(all heads)|beta]
    slow_out = 3 * H + num_head
    for k in range(num_layers):
        params["layers"].append({
            "type": "fast",
            "ln_g": jnp.ones((1, hidden), jnp.float32),
            "ln_b": jnp.zeros((1, hidden), jnp.float32),
            "slow_w": _uniform(next(keys), (hidden, slow_out), hidden),
            "out_w": _uniform(next(keys), (hidden, hidden), hidden),
        })
        if k != num_layers - 1:
            params["layers"].append({
                "type": "ffn",
                "ln_g": jnp.ones((1, hidden), jnp.float32),
                "ln_b": jnp.zeros((1, hidden), jnp.float32),
                "w1": _uniform(next(keys), (hidden, dim_ff), hidden),
                "b1": _uniform(next(keys), (1, dim_ff), hidden),
                "w2": _uniform(next(keys), (dim_ff, hidden), dim_ff),
                "b2": _uniform(next(keys), (1, hidden), dim_ff),
            })
    return params


def fast_ff_layer(x, p, num_head, dim_head):
    # x: (B, S, H) -- activations stay batch-major end to end (no transposes),
    # only contiguous (free) reshapes between pallas_calls.
    B, S, H = x.shape
    x2 = x.reshape(B * S, H)
    qkvb = ln_linear(x2, p["ln_g"], p["ln_b"], p["slow_w"])          # (B*S, 3H+nh)
    out = delta_attention(qkvb.reshape(B, S, -1), num_head, dim_head)  # (B, S, H)
    y2 = out_linear_residual(x2, out.reshape(B * S, H), p["out_w"])
    return y2.reshape(B, S, H)


def transformer_ff_layer(x, p):
    B, S, H = x.shape
    x2 = x.reshape(B * S, H)
    out = ffn_block(x2, p["ln_g"], p["ln_b"], p["w1"], p["b1"], p["w2"], p["b2"])
    return out.reshape(B, S, H)


def deltanet_forward(x, params, num_head, dim_head):
    # x: (B, S, input_dim) -> (B, S, H)
    B, S, in_dim = x.shape
    H = num_head * dim_head
    h = linear_bias(x.reshape(B * S, in_dim), params["in_w"], params["in_b"])
    h = h.reshape(B, S, H)
    for layer in params["layers"]:
        if layer["type"] == "fast":
            h = fast_ff_layer(h, layer, num_head, dim_head)
        else:
            h = transformer_ff_layer(h, layer)
    # TODO(synk): nn.Dropout omitted (inference / dropout=0.0 is identity).
    return h


# ----------------------------------------------------------------------------
# pure-JAX reference (serial per-timestep delta rule) for numerical validation
# ----------------------------------------------------------------------------
def _ref_forward(x, params, num_head, dim_head):
    B, S, _ = x.shape
    nh, dh = num_head, dim_head
    H = nh * dh
    h = x @ params["in_w"] + params["in_b"][0]
    for layer in params["layers"]:
        g, b = layer["ln_g"][0], layer["ln_b"][0]
        xn = _layernorm(h, g, b)
        if layer["type"] == "fast":
            qkvb = xn @ layer["slow_w"]
            q = jax.nn.softmax(qkvb[..., 0 * H:1 * H].reshape(B, S, nh, dh), axis=-1)
            k = jax.nn.softmax(qkvb[..., 1 * H:2 * H].reshape(B, S, nh, dh), axis=-1)
            v = qkvb[..., 2 * H:3 * H].reshape(B, S, nh, dh)
            beta = jax.nn.sigmoid(qkvb[..., 3 * H:])
            W = jnp.zeros((B, nh, dh, dh), jnp.float32)
            outs = []
            for t in range(S):
                kt, qt, vt = k[:, t], q[:, t], v[:, t]
                bt = beta[:, t][..., None]
                v_old = jnp.einsum('bhd,bhde->bhe', kt, W)
                delta = bt * (vt - v_old)
                W = W + jnp.einsum('bhd,bhe->bhde', kt, delta)
                outs.append(jnp.einsum('bhd,bhde->bhe', qt, W))
            o = jnp.stack(outs, axis=1).reshape(B, S, H)
            h = h + o @ layer["out_w"]
        else:
            y = jnp.maximum(xn @ layer["w1"] + layer["b1"][0], 0.0)
            h = h + y @ layer["w2"] + layer["b2"][0]
    return h


# ----------------------------------------------------------------------------
if __name__ == "__main__":
    input_dim, hidden, num_layers = 16, 32, 2
    num_head, dim_head, dim_ff = 4, 8, 64
    assert num_head * dim_head == hidden
    bsz, slen = 2, 8

    kp, kx = jax.random.split(jax.random.PRNGKey(0))
    params = init_params(kp, input_dim, hidden, num_layers, num_head, dim_head, dim_ff)
    x = jax.random.normal(kx, (bsz, slen, input_dim), jnp.float32)

    out = jax.block_until_ready(deltanet_forward(x, params, num_head, dim_head))
    assert out.shape == (bsz, slen, hidden)
    assert bool(jnp.all(jnp.isfinite(out)))

    ref = _ref_forward(x, params, num_head, dim_head)
    max_err = float(jnp.max(jnp.abs(out - ref)))
    assert max_err < 1e-3, f"mismatch vs serial reference: {max_err}"

    print("KERNEL_OK")
</pallas_src>

<mosaic_0001>
module attributes {stable_mosaic.version = 11 : i64} {
  func.func @_linear_bias_kernel(%arg0: i32, %arg1: i32, %arg2: memref<16x16xf32, #tpu.memory_space<vmem>>, %arg3: memref<16x32xf32, #tpu.memory_space<vmem>>, %arg4: memref<1x32xf32, #tpu.memory_space<vmem>>, %arg5: memref<16x32xf32, #tpu.memory_space<vmem>>) attributes {dimension_semantics = [#tpu.dimension_semantics<parallel>, #tpu.dimension_semantics<parallel>], iteration_bounds = array<i64: 1, 1>, scalar_prefetch = 0 : i64, scratch_operands = 0 : i64, tpu.core_type = #tpu.core_type<tc>, window_params = [{transform_indices = @transform_0, window_bounds = array<i64: 16, 16>}, {transform_indices = @transform_1, window_bounds = array<i64: 16, 32>}, {transform_indices = @transform_2, window_bounds = array<i64: 1, 32>}, {transform_indices = @transform_3, window_bounds = array<i64: 16, 32>}]} {
    %c0 = arith.constant 0 : index
    %c0_0 = arith.constant 0 : index
    %0 = vector.load %arg2[%c0, %c0_0] : memref<16x16xf32, #tpu.memory_space<vmem>>, vector<16x16xf32>
    %c0_1 = arith.constant 0 : index
    %c0_2 = arith.constant 0 : index
    %1 = vector.load %arg3[%c0_1, %c0_2] : memref<16x32xf32, #tpu.memory_space<vmem>>, vector<16x32xf32>
    %cst = arith.constant dense<0.000000e+00> : vector<16x32xf32>
    %2 = tpu.matmul %0, %1, %cst {dimension_numbers = #tpu.dot_dimension_numbers<[1], [0], [0], [1], [0, 0, 1, 1], [], []>} : vector<16x16xf32>, vector<16x32xf32>, vector<16x32xf32> -> vector<16x32xf32>
    %c0_3 = arith.constant 0 : index
    %c0_4 = arith.constant 0 : index
    %3 = vector.load %arg4[%c0_3, %c0_4] : memref<1x32xf32, #tpu.memory_space<vmem>>, vector<1x32xf32>
    %4 = vector.broadcast %3 : vector<1x32xf32> to vector<16x32xf32>
    %5 = arith.addf %2, %4 : vector<16x32xf32>
    %c0_5 = arith.constant 0 : index
    %c0_6 = arith.constant 0 : index
    %6 = vector.load %arg5[%c0_5, %c0_6] : memref<16x32xf32, #tpu.memory_space<vmem>>, vector<16x32xf32>
    tpu.vector_store %arg5[%c0_5, %c0_6], %5 {strides = array<i32>} : memref<16x32xf32, #tpu.memory_space<vmem>>, vector<16x32xf32>,
    return
  }
  func.func @transform_0(%arg0: i32, %arg1: i32) -> (i32, i32) {
    %c0_i32 = arith.constant 0 : i32
    %c0_i32_0 = arith.constant 0 : i32
    return %arg0, %c0_i32 : i32, i32
  }
  func.func @transform_1(%arg0: i32, %arg1: i32) -> (i32, i32) {
    %c0_i32 = arith.constant 0 : i32
    %c0_i32_0 = arith.constant 0 : i32
    return %c0_i32, %arg1 : i32, i32
  }
  func.func @transform_2(%arg0: i32, %arg1: i32) -> (i32, i32) {
    %c0_i32 = arith.constant 0 : i32
    %c0_i32_0 = arith.constant 0 : i32
    return %c0_i32, %arg1 : i32, i32
  }
  func.func @transform_3(%arg0: i32, %arg1: i32) -> (i32, i32) {
    %c0_i32 = arith.constant 0 : i32
    return %arg0, %arg1 : i32, i32
  }
}

</mosaic_0001>

<bundles_post_ra>
// kernel: tpu_custom_call.1
= control target key start
LH: loop header
LB: loop body
LE: loop exit
PB: predicated region body
PF: predicated region fallthrough
CT: control target
= control target key end

     0   :  { %8 = vsyncpa [#allocation3], 0  ;;  %s242_s0 = inlined_call_operand.hbm [shape: f32[16,16], index: 0, kind: input, shape index: {}]   ;;  %s243_s1 = inlined_call_operand.hbm [shape: f32[16,32], index: 1, kind: input, shape index: {}]   ;;  %s244_s2 = inlined_call_operand.vmem [shape: f32[1,32], index: 2, kind: input, shape index: {}]   ;;  %s245_s3 = inlined_call_operand.hbm [shape: f32[16,32], index: 3, kind: output, shape index: {}]  }
   0x1   :  { %9 = vsyncpa [#allocation6], 0 }
   0x2   :  { %10 = vsyncpa [#allocation4], 0  ;;  %s15_s14 = sshll.u32 %s242_s0, 4  ;;  %s196_s15 = smov [#allocation2]   ;;  %s16_s14 = int_to_ptr.hbm [resolvable:$true] %s15_s14 }
   0x3   :  { %s17_s16 = sshll.u32 %s196_s15, 4  ;;  %s28_s19 = sshll.u32 %s243_s1, 4  ;;  %s18_s16 = int_to_ptr.vmem [resolvable:$true] %s17_s16  ;;  %s29_s19 = int_to_ptr.hbm [resolvable:$true] %s28_s19 }
   0x4   :  { %s197_s20 = smov 128   ;;  %s198_s21 = smov 8  }
   0x5   :  { %23 = dma.hbm_to_vmem [thread:$0]  %s16_s14, 256, %s18_s16, [#allocation3], %s197_s20, %s197_s20, %s198_s21  }
   0x6   :  { %s199_s22 = smov [#allocation5]  }
   0x7   :  { %s30_s23 = sshll.u32 %s199_s22, 4  ;;  %s31_s23 = int_to_ptr.vmem [resolvable:$true] %s30_s23 }
   0x8   :  { %36 = dma.hbm_to_vmem [thread:$0]  %s29_s19, 256, %s31_s23, [#allocation6], %s197_s20, %s197_s20, %s198_s21  }
   0x9   :  { %190 = dma.done.wait [#allocation3], 256  }
   0xa   :  { %191 = vsyncadd [#allocation3], 4294967040 }
   0xb   :  { %192 = dma.done.wait [#allocation6], 256  }
   0xc   :  { %193 = vsyncadd [#allocation6], 4294967040  ;;  %v50_v0 = vld [vmem:[#allocation5 + $0x8] sm:$0xff]  ;;  %v49_v1 = vld [vmem:[#allocation5] sm:$0xff]  ;;  %vm55_vm0 = vcmask 130048   ;;  %s200_s24 = smov [#allocation7]  }
   0xd   :  { %76 = vmatpush.msra.mxu0 %v50_v0  ;;  %110 = vmatpush.msra.mxu1 %v50_v0  ;;  %v47_v2 = vld [vmem:[#allocation2] sm:$0xff]  ;;  %v48_v3 = vld [vmem:[#allocation2 + $0x8] sm:$0xff]  ;;  %s92_s25 = sshll.u32 %s200_s24, 4  ;;  %s94_s28 = sshll.u32 %s245_s3, 4  ;;  %vm85_vm1 = vcmask 261120   ;;  %s93_s25 = int_to_ptr.vmem [resolvable:$true] %s92_s25  ;;  %s95_s28 = int_to_ptr.hbm [resolvable:$true] %s94_s28 }
   0xe   :  { %v117_v4 = vld [vmem:[%s244_s2] ss:$0 sm:$0xff] }
   0xf   :  { %77 = vmatpush.msra.mxu0 %v49_v1  ;;  %111 = vmatpush.msra.mxu1 %v49_v1 }
  0x10   :  { %108 = vmatmul.msk.f32.vlgmr.msra.gmra.mxu0 %vm55_vm0, %v47_v2  ;;  %109 = vmatmul.msk.f32.vlgmr.msra.gmra.mxu1 %vm55_vm0, %v48_v3 }
  0x8d   :  { %v79_v5 = vpop.f32.mrf.mxu0  ;;  %v82_v6 = vpop.f32.mrf.mxu1 }
  0x8e   :  { %v80_v7 = vadd.f32 %v117_v4, %v79_v5  ;;  %v83_v8 = vadd.f32 %v117_v4, %v82_v6 }
  0x90   :  { %86 = vst.msk [vmem:[#allocation7] sm:$0xff] %vm85_vm1, %v80_v7 }
  0x91   :  { %87 = vst.msk [vmem:[#allocation7 + $0x8] sm:$0xff] %vm85_vm1, %v83_v8 }
  0x92   :  { %100 = dma.vmem_to_hbm [thread:$0]  %s93_s25, 256, %s95_s28, [#allocation4], %s197_s20, %s197_s20, %s198_s21  }
  0x93   :  { %194 = dma.done.wait [#allocation4], 256  }
  0x94   :  { %195 = vsyncadd [#allocation4], 4294967040 }
  0x95   :  { %105 = vsyncpa [#allocation3], 1 }
  0x96   :  { %106 = vsyncpa [#allocation6], 1 }
  0x97   :  { %107 = vsyncpa [#allocation4], 1 }

</bundles_post_ra>
